<compile_context>
chip_gen: v7x
topology: tpu7x:2x2x1
jax: 0.10.0
libtpu: 0.0.40
codegen_flags: <defaults>
</compile_context>

<pallas_src>
import functools

import jax
import jax.numpy as jnp
from jax.experimental import pallas as pl
from jax.experimental.pallas import tpu as pltpu


# ---------------------------------------------------------------------------
# Helpers
# ---------------------------------------------------------------------------
def _round_up(x, m):
    return ((x + m - 1) // m) * m


def _pad2d(x, rows, cols):
    r, c = x.shape
    if r == rows and c == cols:
        return x
    return jnp.pad(x, ((0, rows - r), (0, cols - c)))


@functools.lru_cache(maxsize=None)
def _vmem_plan():
    """Return (vmem_budget_bytes, max_k_slab) sized per TPU generation.

    128 MiB parts (v5e / v6e): ~96 MiB budget, K slabs up to 8192.
    64 MiB parts  (v7x):       ~48 MiB budget, K slabs up to 4096.
    Falls back to the conservative (v7x-safe) plan if the query fails.
    """
    phys = 64 * 1024 * 1024
    try:
        info = pltpu.get_tpu_info()
        for attr in ("vmem_capacity_bytes", "vmem_bytes", "vmem_size_bytes"):
            val = getattr(info, attr, None)
            if val:
                phys = int(val)
                break
    except Exception:
        pass
    if phys >= 96 * 1024 * 1024:
        return 96 * 1024 * 1024, 8192
    return 48 * 1024 * 1024, 4096


# ---------------------------------------------------------------------------
# Matmul kernels (bf16 MXU feed, f32 accumulation)
# ---------------------------------------------------------------------------
def _matmul_single_k_kernel(x_ref, w_ref, o_ref):
    # One K step: no accumulator scratch, write the MXU result directly.
    o_ref[...] = jnp.dot(x_ref[...], w_ref[...],
                         preferred_element_type=jnp.float32)


def _matmul_k_tiled_kernel(x_ref, w_ref, o_ref, acc_ref):
    k = pl.program_id(2)

    @pl.when(k == 0)
    def _init():
        acc_ref[...] = jnp.zeros_like(acc_ref)

    acc_ref[...] += jnp.dot(x_ref[...], w_ref[...],
                            preferred_element_type=jnp.float32)

    @pl.when(k == pl.num_programs(2) - 1)
    def _store():
        o_ref[...] = acc_ref[...]


class PallasLinear:
    """y = x @ W on the MXU; W is padded + cast to bf16 ONCE at construction."""

    def __init__(self, w, *, tk_max=None):
        self.K, self.N = w.shape
        budget, plan_tk = _vmem_plan()
        self.vmem_budget = int(budget)
        tk_max = plan_tk if tk_max is None else tk_max

        # N: 128-lane alignment; split into two lane-dense tiles when possible
        # so the "parallel" N axis lets v7x's second TensorCore stream half of
        # W (the matmul is HBM / weight-streaming bound; the few-KB output is
        # irrelevant).
        self.N_pad = _round_up(self.N, 128)
        half = self.N_pad // 2
        self.tn = half if (self.N_pad > 256 and half % 128 == 0) else self.N_pad

        # K: single step if it fits one slab, else stream large K slabs
        # (large slabs amortize the ~0.35us per-grid-step pipeline overhead).
        if self.K <= tk_max:
            self.K_pad = _round_up(self.K, 128)
            self.tk = self.K_pad
        else:
            self.tk = tk_max
            self.K_pad = _round_up(self.K, self.tk)

        # Pad + cast once (avoids a weight-sized HBM pad pass per forward).
        self.w = _pad2d(jnp.asarray(w).astype(jnp.bfloat16),
                        self.K_pad, self.N_pad)

    def __call__(self, x):
        M, K = x.shape
        assert K == self.K
        M_pad = _round_up(max(M, 1), 16)          # bf16 sublane packing
        tm = min(M_pad, 512)
        M_pad = _round_up(M_pad, tm)
        xb = _pad2d(x.astype(jnp.bfloat16), M_pad, self.K_pad)

        tk, tn = self.tk, self.tn
        gm, gn, gk = M_pad // tm, self.N_pad // tn, self.K_pad // tk
        out_shape = jax.ShapeDtypeStruct((M_pad, self.N_pad), jnp.float32)

        if gk == 1:
            out = pl.pallas_call(
                _matmul_single_k_kernel,
                out_shape=out_shape,
                grid_spec=pltpu.PrefetchScalarGridSpec(
                    num_scalar_prefetch=0,
                    grid=(gm, gn),
                    in_specs=[pl.BlockSpec((tm, tk), lambda i, j: (i, 0)),
                              pl.BlockSpec((tk, tn), lambda i, j: (0, j))],
                    out_specs=pl.BlockSpec((tm, tn), lambda i, j: (i, j))),
                compiler_params=pltpu.CompilerParams(
                    dimension_semantics=("parallel", "parallel"),
                    vmem_limit_bytes=self.vmem_budget),
            )(xb, self.w)
        else:
            out = pl.pallas_call(
                _matmul_k_tiled_kernel,
                out_shape=out_shape,
                grid_spec=pltpu.PrefetchScalarGridSpec(
                    num_scalar_prefetch=0,
                    grid=(gm, gn, gk),
                    in_specs=[pl.BlockSpec((tm, tk), lambda i, j, k: (i, k)),
                              pl.BlockSpec((tk, tn), lambda i, j, k: (k, j))],
                    out_specs=pl.BlockSpec((tm, tn), lambda i, j, k: (i, j)),
                    scratch_shapes=[pltpu.VMEM((tm, tn), jnp.float32)]),
                compiler_params=pltpu.CompilerParams(
                    dimension_semantics=("parallel", "parallel", "arbitrary"),
                    vmem_limit_bytes=self.vmem_budget),
            )(xb, self.w)
        return out[:M, :self.N]


# ---------------------------------------------------------------------------
# Row-wise L2 normalization kernel (tiny (B, D) tensor)
# ---------------------------------------------------------------------------
def _l2norm_kernel(x_ref, o_ref):
    x = x_ref[...]
    # torch semantics: x / x.norm(dim=-1), no eps.  All-zero (padded) rows
    # produce NaN but are sliced away by the wrapper.
    inv = jax.lax.rsqrt(jnp.sum(x * x, axis=-1, keepdims=True))
    o_ref[...] = x * inv


def pallas_l2norm(x):
    M, N = x.shape
    M_pad = _round_up(max(M, 1), 8)
    tm = min(M_pad, 256)
    M_pad = _round_up(M_pad, tm)
    xp = _pad2d(x, M_pad, N)
    out = pl.pallas_call(
        _l2norm_kernel,
        out_shape=jax.ShapeDtypeStruct((M_pad, N), x.dtype),
        grid_spec=pltpu.PrefetchScalarGridSpec(
            num_scalar_prefetch=0,
            grid=(M_pad // tm,),
            in_specs=[pl.BlockSpec((tm, N), lambda i: (i, 0))],
            out_specs=pl.BlockSpec((tm, N), lambda i: (i, 0))),
        compiler_params=pltpu.CompilerParams(
            dimension_semantics=("parallel",)),
    )(xp)
    return out[:M]


# ---------------------------------------------------------------------------
# Synthetic CLIP model (deterministic params) + clip_forward semantics
# ---------------------------------------------------------------------------
class SyntheticCLIP:
    """Minimal stand-in for the CLIP model wrapped by CLIPExtractor."""

    def __init__(self, key, *, channels, height, width, seq_len, vocab,
                 text_embed, feat_dim):
        k1, k2, k3 = jax.random.split(key, 3)
        self.C, self.H, self.W = channels, height, width
        self.L, self.V, self.E, self.D = seq_len, vocab, text_embed, feat_dim
        img_in = channels * height * width
        txt_in = seq_len * text_embed
        w_img = (jax.random.normal(k1, (img_in, feat_dim), jnp.float32)
                 * (1.0 / jnp.sqrt(img_in)))
        w_txt = (jax.random.normal(k3, (txt_in, feat_dim), jnp.float32)
                 * (1.0 / jnp.sqrt(txt_in)))
        # Projections hold pre-padded bf16 weights (prepared once at init).
        self.img_proj = PallasLinear(w_img)
        self.txt_proj = PallasLinear(w_txt)
        self.tok_emb = (jax.random.normal(k2, (vocab, text_embed), jnp.float32)
                        * 0.02).astype(jnp.bfloat16)

    def encode_image(self, image):
        # image: (B, C, H, W) NCHW -> flatten row-major (free reshape)
        B = image.shape[0]
        return self.img_proj(image.reshape(B, -1))            # (B, D) f32

    def encode_text(self, text):
        # TODO(synk): the token-embedding gather stays as plain-JAX jnp.take;
        # a PrefetchScalarGridSpec + pl.Element row-gather would avoid the
        # (B, L, E) HBM intermediate for real CLIP sizes.
        B = text.shape[0]
        emb = jnp.take(self.tok_emb, text, axis=0)            # (B, L, E) bf16
        return self.txt_proj(emb.reshape(B, -1))              # (B, D) f32


def clip_forward(model, image, text):
    """Mirrors the PyTorch clip_forward."""
    if image.ndim == 5:
        # encode_image is linear, so (enc(x1) + enc(x2)) / 2 equals
        # enc((x1 + x2) / 2) up to bf16 rounding of the averaged input;
        # averaging first halves FLOPs and weight-streaming HBM traffic.
        image_features = model.encode_image(
            (image[:, 0, ...] + image[:, 1, ...]) * 0.5)
    else:
        image_features = model.encode_image(image)
    text_features = model.encode_text(text)
    image_features = pallas_l2norm(image_features)
    text_features = pallas_l2norm(text_features)
    return image_features, text_features


class CLIPExtractor:
    def __init__(self, clip_model, args=None):
        self.clip_model = clip_model
        self.args = args

    def __call__(self, image, text):
        return clip_forward(self.clip_model, image, text)


# ---------------------------------------------------------------------------
# Demo / smoke test
# ---------------------------------------------------------------------------
if __name__ == "__main__":
    key = jax.random.PRNGKey(0)
    k_model, k_img, k_txt, k_x, k_w = jax.random.split(key, 5)

    B, C, H, W = 2, 4, 16, 16
    L, V, E, D = 8, 16, 32, 32

    model = SyntheticCLIP(k_model, channels=C, height=H, width=W,
                          seq_len=L, vocab=V, text_embed=E, feat_dim=D)
    extractor = CLIPExtractor(model, args=None)

    image = jax.random.normal(k_img, (B, C, H, W), jnp.float32)   # NCHW
    text = jax.random.randint(k_txt, (B, L), 0, V, jnp.int32)

    img_feat, txt_feat = extractor(image, text)
    img_feat = jax.block_until_ready(img_feat)
    txt_feat = jax.block_until_ready(txt_feat)

    # Pure-JAX reference (same bf16-rounded operands, f32 accumulation).
    def ref_forward(image, text):
        w_img = model.img_proj.w[:model.img_proj.K, :model.img_proj.N]
        w_txt = model.txt_proj.w[:model.txt_proj.K, :model.txt_proj.N]
        xi_in = image.reshape(B, -1).astype(jnp.bfloat16).astype(jnp.float32)
        xi = xi_in @ w_img.astype(jnp.float32)
        emb = jnp.take(model.tok_emb, text, axis=0).reshape(B, -1)
        xt = emb.astype(jnp.float32) @ w_txt.astype(jnp.float32)
        xi = xi / jnp.linalg.norm(xi, axis=-1, keepdims=True)
        xt = xt / jnp.linalg.norm(xt, axis=-1, keepdims=True)
        return xi, xt

    ref_img, ref_txt = ref_forward(image, text)
    assert img_feat.shape == (B, D) and txt_feat.shape == (B, D)
    assert jnp.allclose(img_feat, ref_img, atol=2e-3, rtol=2e-3)
    assert jnp.allclose(txt_feat, ref_txt, atol=2e-3, rtol=2e-3)

    # Exercise the 5-D two-view branch of clip_forward.
    image5 = jnp.stack([image, image * 0.5 + 0.1], axis=1)  # (B, 2, C, H, W)
    img_feat5, txt_feat5 = extractor(image5, text)
    img_feat5 = jax.block_until_ready(img_feat5)
    assert img_feat5.shape == (B, D)
    assert bool(jnp.all(jnp.isfinite(img_feat5)))
    assert jnp.allclose(jnp.linalg.norm(img_feat5, axis=-1),
                        jnp.ones((B,)), atol=1e-3)

    # Exercise the K-streaming (accumulator) path and the split-N grid with a
    # deliberately small K slab; check against a JAX reference.
    Kt, Nt, Mt = 640, 512, 4
    w_t = (jax.random.normal(k_w, (Kt, Nt), jnp.float32)
           * (1.0 / jnp.sqrt(Kt)))
    x_t = jax.random.normal(k_x, (Mt, Kt), jnp.float32)
    lin_t = PallasLinear(w_t, tk_max=256)          # -> grid_k = 3, grid_n = 2
    y_t = jax.block_until_ready(lin_t(x_t))
    y_ref = (x_t.astype(jnp.bfloat16).astype(jnp.float32)
             @ w_t.astype(jnp.bfloat16).astype(jnp.float32))
    assert y_t.shape == (Mt, Nt)
    assert jnp.allclose(y_t, y_ref, atol=2e-3, rtol=2e-3)

    print("KERNEL_OK")
</pallas_src>

<mosaic_0001>
module attributes {stable_mosaic.version = 11 : i64} {
  func.func @_matmul_single_k_kernel(%arg0: i32, %arg1: i32, %arg2: memref<16x1024xbf16, #tpu.memory_space<vmem>>, %arg3: memref<1024x128xbf16, #tpu.memory_space<vmem>>, %arg4: memref<16x128xf32, #tpu.memory_space<vmem>>) attributes {dimension_semantics = [#tpu.dimension_semantics<parallel>, #tpu.dimension_semantics<parallel>], iteration_bounds = array<i64: 1, 1>, scalar_prefetch = 0 : i64, scratch_operands = 0 : i64, tpu.core_type = #tpu.core_type<tc>, window_params = [{transform_indices = @transform_0, window_bounds = array<i64: 16, 1024>}, {transform_indices = @transform_1, window_bounds = array<i64: 1024, 128>}, {transform_indices = @transform_2, window_bounds = array<i64: 16, 128>}]} {
    %c0 = arith.constant 0 : index
    %c0_0 = arith.constant 0 : index
    %0 = vector.load %arg2[%c0, %c0_0] : memref<16x1024xbf16, #tpu.memory_space<vmem>>, vector<16x1024xbf16>
    %c0_1 = arith.constant 0 : index
    %c0_2 = arith.constant 0 : index
    %1 = vector.load %arg3[%c0_1, %c0_2] : memref<1024x128xbf16, #tpu.memory_space<vmem>>, vector<1024x128xbf16>
    %cst = arith.constant dense<0.000000e+00> : vector<16x128xf32>
    %2 = tpu.matmul %0, %1, %cst {dimension_numbers = #tpu.dot_dimension_numbers<[1], [0], [0], [1], [0, 0, 1, 1], [], []>} : vector<16x1024xbf16>, vector<1024x128xbf16>, vector<16x128xf32> -> vector<16x128xf32>
    %c0_3 = arith.constant 0 : index
    %c0_4 = arith.constant 0 : index
    %3 = vector.load %arg4[%c0_3, %c0_4] : memref<16x128xf32, #tpu.memory_space<vmem>>, vector<16x128xf32>
    tpu.vector_store %arg4[%c0_3, %c0_4], %2 {strides = array<i32>} : memref<16x128xf32, #tpu.memory_space<vmem>>, vector<16x128xf32>,
    return
  }
  func.func @transform_0(%arg0: i32, %arg1: i32) -> (i32, i32) {
    %c0_i32 = arith.constant 0 : i32
    %c0_i32_0 = arith.constant 0 : i32
    return %arg0, %c0_i32 : i32, i32
  }
  func.func @transform_1(%arg0: i32, %arg1: i32) -> (i32, i32) {
    %c0_i32 = arith.constant 0 : i32
    %c0_i32_0 = arith.constant 0 : i32
    return %c0_i32, %arg1 : i32, i32
  }
  func.func @transform_2(%arg0: i32, %arg1: i32) -> (i32, i32) {
    %c0_i32 = arith.constant 0 : i32
    return %arg0, %arg1 : i32, i32
  }
}

</mosaic_0001>

<bundles_post_ra>
// kernel: tpu_custom_call.1
= control target key start
LH: loop header
LB: loop body
LE: loop exit
PB: predicated region body
PF: predicated region fallthrough
CT: control target
= control target key end

     0   :  { %7 = vsyncpa [#allocation3], 0  ;;  %s1150_s0 = inlined_call_operand.hbm [shape: bf16[16,1024], index: 0, kind: input, shape index: {}]   ;;  %s1151_s1 = inlined_call_operand.hbm [shape: bf16[1024,128], index: 1, kind: input, shape index: {}]   ;;  %s1152_s2 = inlined_call_operand.hbm [shape: f32[16,128], index: 2, kind: output, shape index: {}]  }
   0x1   :  { %8 = vsyncpa [#allocation6], 0 }
   0x2   :  { %9 = vsyncpa [#allocation4], 0  ;;  %s1090_s9 = smov [#allocation2]   ;;  %s1018_s13 = scalar_lea.hbm %s1150_s0, 1024 }
   0x3   :  { %s15_s10 = sshll.u32 %s1090_s9, 4  ;;  %p1019_p0 = scmp.ne.s32.totalorder %s1150_s0, %s1018_s13  ;;  %s16_s10 = int_to_ptr.vmem [resolvable:$true] %s15_s10 }
   0x4   :  { %p1022_p1 = scmp.lt.u32.totalorder %s1018_s13, %s1150_s0 }
   0x6   :  { %p1024_p2 = pnand %p1022_p1, %p1019_p0 }
   0x8   :  { %1027 = shalt.err (!%p1024_p2)
}
   0x9   :  { %s1028_s18 = scalar_lea.vmem %s16_s10, 1024  ;;  %p1033_p4 = scmp.lt.s32.totalorder %s16_s10, %s16_s10 }
   0xa   :  { %p1029_p3 = scmp.ne.s32.totalorder %s16_s10, %s1028_s18  ;;  %p1034_p5 = scmp.lt.s32.totalorder %s1028_s18, %s1028_s18 }
   0xc   :  { %p1035_p6 = por %p1034_p5, %p1033_p4 }
   0xe   :  { %p1036_p7 = pnand %p1035_p6, %p1029_p3 }
  0x10   :  { %1039 = shalt.err (!%p1036_p7)
}
  0x11   :  { %s1091_s19 = smov 512   ;;  %s1092_s20 = smov 32  }
  0x12   :  { %21 = dma.hbm_to_vmem [thread:$0]  %s1150_s0, 1024, %s16_s10, [#allocation3], %s1091_s19, %s1091_s19, %s1092_s20  }
  0x13   :  { %s1093_s23 = smov [#allocation5]   ;;  %s1040_s27 = scalar_lea.hbm %s1151_s1, 8192 }
  0x14   :  { %s27_s24 = sshll.u32 %s1093_s23, 4  ;;  %p1041_p8 = scmp.ne.s32.totalorder %s1151_s1, %s1040_s27  ;;  %s28_s24 = int_to_ptr.vmem [resolvable:$true] %s27_s24 }
  0x15   :  { %p1044_p9 = scmp.lt.u32.totalorder %s1040_s27, %s1151_s1 }
  0x17   :  { %p1046_p10 = pnand %p1044_p9, %p1041_p8 }
  0x19   :  { %1049 = shalt.err (!%p1046_p10)
}
  0x1a   :  { %s1050_s4 = scalar_lea.vmem %s28_s24, 8192  ;;  %p1055_p12 = scmp.lt.s32.totalorder %s28_s24, %s28_s24 }
  0x1b   :  { %p1051_p11 = scmp.ne.s32.totalorder %s28_s24, %s1050_s4  ;;  %p1056_p13 = scmp.lt.s32.totalorder %s1050_s4, %s1050_s4 }
  0x1d   :  { %p1057_p0 = por %p1056_p13, %p1055_p12 }
  0x1f   :  { %p1058_p1 = pnand %p1057_p0, %p1051_p11 }
  0x21   :  { %1061 = shalt.err (!%p1058_p1)
}
  0x22   :  { %s1094_s0 = smov 64   ;;  %s1095_s5 = smov 4  }
  0x23   :  { %33 = dma.hbm_to_vmem [thread:$0]  %s1151_s1, 8192, %s28_s24, [#allocation6], %s1094_s0, %s1094_s0, %s1095_s5  }
  0x24   :  { %1084 = dma.done.wait [#allocation3], 1024  }
  0x25   :  { %1085 = vsyncadd [#allocation3], 4294966272 }
  0x26   :  { %1086 = dma.done.wait [#allocation6], 8192  }
  0x27   :  { %1087 = vsyncadd [#allocation6], 4294959104  ;;  %v954_v0 = vld [vmem:[#allocation5 + $0x40] sm:$0xff]   ;;  %v958_v4 = vld [vmem:[#allocation5 + $0x48] sm:$0xff]   ;;  %s1096_s1 = smov [#allocation7]  }
  0x28   :  { %v955_v1 = vld [vmem:[#allocation5 + $0xc0] sm:$0xff]   ;;  %857 = vmatprep.subr.bf16.mxu0 %v954_v0  ;;  %v959_v5 = vld [vmem:[#allocation5 + $0xc8] sm:$0xff]   ;;  %v962_v8 = vld [vmem:[#allocation5 + $0x50] sm:$0xff]   ;;  %s772_s8 = sshll.u32 %s1096_s1, 4  ;;  %s773_s8 = int_to_ptr.vmem [resolvable:$true] %s772_s8 }
  0x29   :  { %v956_v2 = vld [vmem:[#allocation5] sm:$0xff]   ;;  %879 = vmatprep.subr.bf16.mxu1 %v955_v1  ;;  %v960_v6 = vld [vmem:[#allocation5 + $0x8] sm:$0xff]   ;;  %v963_v9 = vld [vmem:[#allocation5 + $0xd0] sm:$0xff]   ;;  %s1062_s9 = scalar_lea.vmem %s773_s8, 256  ;;  %p1067_p3 = scmp.lt.s32.totalorder %s773_s8, %s773_s8 }
  0x2a   :  { %v957_v3 = vld [vmem:[#allocation5 + $0x80] sm:$0xff]   ;;  %858 = vmatpush3.bf16.msra.mxu0 %v956_v2  ;;  %v961_v7 = vld [vmem:[#allocation5 + $0x88] sm:$0xff]   ;;  %v964_v10 = vld [vmem:[#allocation5 + $0x10] sm:$0xff]   ;;  %p1063_p2 = scmp.ne.s32.totalorder %s773_s8, %s1062_s9  ;;  %p1068_p4 = scmp.lt.s32.totalorder %s1062_s9, %s1062_s9 }
  0x2b   :  { %880 = vmatpush3.bf16.msra.mxu1 %v957_v3  ;;  %859 = vmatprep.subr.bf16.mxu0 %v958_v4  ;;  %v965_v11 = vld [vmem:[#allocation5 + $0x90] sm:$0xff]   ;;  %v966_v12 = vld [vmem:[#allocation5 + $0x58] sm:$0xff]   ;;  %v970_v16 = vld [vmem:[#allocation5 + $0x60] sm:$0xff]  }
  0x2c   :  { %881 = vmatprep.subr.bf16.mxu1 %v959_v5  ;;  %v967_v13 = vld [vmem:[#allocation5 + $0xd8] sm:$0xff]   ;;  %v971_v17 = vld [vmem:[#allocation5 + $0xe0] sm:$0xff]   ;;  %v974_v20 = vld [vmem:[#allocation5 + $0x68] sm:$0xff]   ;;  %p1069_p5 = por %p1068_p4, %p1067_p3 }
  0x2d   :  { %v968_v14 = vld [vmem:[#allocation5 + $0x18] sm:$0xff]   ;;  %v972_v18 = vld [vmem:[#allocation5 + $0x20] sm:$0xff]   ;;  %v975_v21 = vld [vmem:[#allocation5 + $0xe8] sm:$0xff]  }
  0x2e   :  { %860 = vmatpush3.bf16.msra.mxu0 %v960_v6  ;;  %v969_v15 = vld [vmem:[#allocation5 + $0x98] sm:$0xff]   ;;  %v973_v19 = vld [vmem:[#allocation5 + $0xa0] sm:$0xff]   ;;  %v976_v22 = vld [vmem:[#allocation5 + $0x28] sm:$0xff]   ;;  %p1070_p6 = pnand %p1069_p5, %p1063_p2 }
  0x2f   :  { %882 = vmatpush3.bf16.msra.mxu1 %v961_v7  ;;  %861 = vmatprep.subr.bf16.mxu0 %v962_v8  ;;  %v977_v23 = vld [vmem:[#allocation5 + $0xa8] sm:$0xff]   ;;  %v978_v24 = vld [vmem:[#allocation5 + $0x70] sm:$0xff]   ;;  %v982_v28 = vld [vmem:[#allocation5 + $0x78] sm:$0xff]  }
  0x30   :  { %883 = vmatprep.subr.bf16.mxu1 %v963_v9  ;;  %v979_v25 = vld [vmem:[#allocation5 + $0xf0] sm:$0xff]   ;;  %v983_v29 = vld [vmem:[#allocation5 + $0xf8] sm:$0xff]   ;;  %v41_v32 = vld [vmem:[#allocation2] sm:$0xff] }
  0x31   :  { %v980_v26 = vld [vmem:[#allocation5 + $0x30] sm:$0xff]   ;;  %v984_v30 = vld [vmem:[#allocation5 + $0x38] sm:$0xff]   ;;  %v45_v33 = vld [vmem:[#allocation2 + $0x20] sm:$0xff] }
  0x32   :  { %862 = vmatpush3.bf16.msra.mxu0 %v964_v10  ;;  %v981_v27 = vld [vmem:[#allocation5 + $0xb0] sm:$0xff]   ;;  %v985_v31 = vld [vmem:[#allocation5 + $0xb8] sm:$0xff]   ;;  %v42_v34 = vld [vmem:[#allocation2 + $0x8] sm:$0xff]  ;;  %v785_v35 = vcombine.low %v41_v32, %v45_v33  ;;  %v786_v36 = vcombine.high %v41_v32, %v45_v33 }
  0x33   :  { %884 = vmatpush3.bf16.msra.mxu1 %v965_v11  ;;  %863 = vmatprep.subr.bf16.mxu0 %v966_v12  ;;  %v46_v37 = vld [vmem:[#allocation2 + $0x28] sm:$0xff]  ;;  %v986_v40 = vld [vmem:[#allocation5 + $0x140] sm:$0xff]   ;;  %v994_v48 = vld [vmem:[#allocation5 + $0x150] sm:$0xff]  }
  0x34   :  { %885 = vmatprep.subr.bf16.mxu1 %v967_v13  ;;  %v787_v38 = vcombine.low %v42_v34, %v46_v37  ;;  %v788_v39 = vcombine.high %v42_v34, %v46_v37  ;;  %633 = vmatprep.mubr.bf16.mxu0 %v786_v36  ;;  %v987_v41 = vld [vmem:[#allocation5 + $0x1c0] sm:$0xff]   ;;  %v990_v44 = vld [vmem:[#allocation5 + $0x148] sm:$0xff]   ;;  %v995_v49 = vld [vmem:[#allocation5 + $0x1d0] sm:$0xff]  }
  0x35   :  { %v988_v42 = vld [vmem:[#allocation5 + $0x100] sm:$0xff]   ;;  %v991_v45 = vld [vmem:[#allocation5 + $0x1c8] sm:$0xff]   ;;  %v996_v50 = vld [vmem:[#allocation5 + $0x110] sm:$0xff]  }
  0x36   :  { %864 = vmatpush3.bf16.msra.mxu0 %v968_v14  ;;  %674 = vmatprep.mubr.bf16.mxu1 %v788_v39  ;;  %v989_v43 = vld [vmem:[#allocation5 + $0x180] sm:$0xff]   ;;  %v992_v46 = vld [vmem:[#allocation5 + $0x108] sm:$0xff]   ;;  %v997_v51 = vld [vmem:[#allocation5 + $0x190] sm:$0xff]  }
  0x37   :  { %886 = vmatpush3.bf16.msra.mxu1 %v969_v15  ;;  %865 = vmatprep.subr.bf16.mxu0 %v970_v16  ;;  %v993_v47 = vld [vmem:[#allocation5 + $0x188] sm:$0xff]   ;;  %v998_v52 = vld [vmem:[#allocation5 + $0x158] sm:$0xff]   ;;  %v1002_v56 = vld [vmem:[#allocation5 + $0x160] sm:$0xff]  }
  0x38   :  { %887 = vmatprep.subr.bf16.mxu1 %v971_v17  ;;  %v999_v53 = vld [vmem:[#allocation5 + $0x1d8] sm:$0xff]   ;;  %v1003_v57 = vld [vmem:[#allocation5 + $0x1e0] sm:$0xff]   ;;  %v1006_v60 = vld [vmem:[#allocation5 + $0x168] sm:$0xff]  }
  0x39   :  { %v1000_v54 = vld [vmem:[#allocation5 + $0x118] sm:$0xff]   ;;  %v1004_v58 = vld [vmem:[#allocation5 + $0x120] sm:$0xff]   ;;  %v1007_v61 = vld [vmem:[#allocation5 + $0x1e8] sm:$0xff]  }
  0x3a   :  { %866 = vmatpush3.bf16.msra.mxu0 %v972_v18  ;;  %v1001_v55 = vld [vmem:[#allocation5 + $0x198] sm:$0xff]   ;;  %v1005_v59 = vld [vmem:[#allocation5 + $0x1a0] sm:$0xff]   ;;  %v1008_v62 = vld [vmem:[#allocation5 + $0x128] sm:$0xff]  }
  0x3b   :  { %888 = vmatpush3.bf16.msra.mxu1 %v973_v19  ;;  %867 = vmatprep.subr.bf16.mxu0 %v974_v20  ;;  %v1009_v63 = vld [vmem:[#allocation5 + $0x1a8] sm:$0xff]   ;;  %v1010_v0 = vld [vmem:[#allocation5 + $0x170] sm:$0xff]   ;;  %v1014_v4 = vld [vmem:[#allocation5 + $0x178] sm:$0xff]  }
  0x3c   :  { %889 = vmatprep.subr.bf16.mxu1 %v975_v21  ;;  %v1011_v1 = vld [vmem:[#allocation5 + $0x1f0] sm:$0xff]   ;;  %v1015_v5 = vld [vmem:[#allocation5 + $0x1f8] sm:$0xff]  }
  0x3d   :  { %v1012_v2 = vld [vmem:[#allocation5 + $0x130] sm:$0xff]   ;;  %v1016_v6 = vld [vmem:[#allocation5 + $0x138] sm:$0xff]  }
  0x3e   :  { %868 = vmatpush3.bf16.msra.mxu0 %v976_v22  ;;  %v1013_v3 = vld [vmem:[#allocation5 + $0x1b0] sm:$0xff]   ;;  %v1017_v7 = vld [vmem:[#allocation5 + $0x1b8] sm:$0xff]  }
  0x3f   :  { %890 = vmatpush3.bf16.msra.mxu1 %v977_v23  ;;  %869 = vmatprep.subr.bf16.mxu0 %v978_v24  ;;  %v43_v8 = vld [vmem:[#allocation2 + $0x10] sm:$0xff]  ;;  %v44_v12 = vld [vmem:[#allocation2 + $0x18] sm:$0xff] }
  0x40   :  { %891 = vmatprep.subr.bf16.mxu1 %v979_v25  ;;  %v47_v9 = vld [vmem:[#allocation2 + $0x30] sm:$0xff]  ;;  %v48_v13 = vld [vmem:[#allocation2 + $0x38] sm:$0xff] }
  0x41   :  { %v789_v10 = vcombine.low %v43_v8, %v47_v9  ;;  %v790_v11 = vcombine.high %v43_v8, %v47_v9  ;;  %v791_v14 = vcombine.low %v44_v12, %v48_v13  ;;  %v792_v15 = vcombine.high %v44_v12, %v48_v13 }
  0x42   :  { %870 = vmatpush3.bf16.msra.mxu0 %v980_v26 }
  0x43   :  { %892 = vmatpush3.bf16.msra.mxu1 %v981_v27  ;;  %871 = vmatprep.subr.bf16.mxu0 %v982_v28 }
  0x44   :  { %893 = vmatprep.subr.bf16.mxu1 %v983_v29 }
  0x46   :  { %872 = vmatpush3.bf16.msra.mxu0 %v984_v30 }
  0x47   :  { %894 = vmatpush3.bf16.msra.mxu1 %v985_v31  ;;  %901 = vmatprep.subr.bf16.mxu0 %v986_v40 }
  0x48   :  { %923 = vmatprep.subr.bf16.mxu1 %v987_v41 }
  0x49   :  { %634 = vmatmul.mubr.bf16.vlgmr.msra.gmra.mrb[0].mxu0 %v785_v35 }
  0x4a   :  { %675 = vmatmul.mubr.bf16.vlgmr.msra.gmra.mrb[0].mxu1 %v787_v38  ;;  %902 = vmatpush3.bf16.msra.mxu0 %v988_v42 }
  0x4b   :  { %924 = vmatpush3.bf16.msra.mxu1 %v989_v43  ;;  %903 = vmatprep.subr.bf16.mxu0 %v990_v44 }
  0x4c   :  { %925 = vmatprep.subr.bf16.mxu1 %v991_v45  ;;  %715 = vmatprep.mubr.bf16.mxu0 %v790_v11 }
  0x4d   :  { %756 = vmatprep.mubr.bf16.mxu1 %v792_v15 }
  0x4e   :  { %904 = vmatpush3.bf16.msra.mxu0 %v992_v46 }
  0x4f   :  { %926 = vmatpush3.bf16.msra.mxu1 %v993_v47  ;;  %905 = vmatprep.subr.bf16.mxu0 %v994_v48 }
  0x50   :  { %927 = vmatprep.subr.bf16.mxu1 %v995_v49 }
  0x52   :  { %906 = vmatpush3.bf16.msra.mxu0 %v996_v50 }
  0x53   :  { %928 = vmatpush3.bf16.msra.mxu1 %v997_v51  ;;  %907 = vmatprep.subr.bf16.mxu0 %v998_v52 }
  0x54   :  { %929 = vmatprep.subr.bf16.mxu1 %v999_v53 }
  0x56   :  { %908 = vmatpush3.bf16.msra.mxu0 %v1000_v54 }
  0x57   :  { %930 = vmatpush3.bf16.msra.mxu1 %v1001_v55  ;;  %909 = vmatprep.subr.bf16.mxu0 %v1002_v56 }
  0x58   :  { %931 = vmatprep.subr.bf16.mxu1 %v1003_v57 }
  0x5a   :  { %910 = vmatpush3.bf16.msra.mxu0 %v1004_v58 }
  0x5b   :  { %932 = vmatpush3.bf16.msra.mxu1 %v1005_v59  ;;  %911 = vmatprep.subr.bf16.mxu0 %v1006_v60 }
  0x5c   :  { %933 = vmatprep.subr.bf16.mxu1 %v1007_v61 }
  0x5e   :  { %912 = vmatpush3.bf16.msra.mxu0 %v1008_v62 }
  0x5f   :  { %934 = vmatpush3.bf16.msra.mxu1 %v1009_v63  ;;  %913 = vmatprep.subr.bf16.mxu0 %v1010_v0 }
  0x60   :  { %935 = vmatprep.subr.bf16.mxu1 %v1011_v1 }
  0x62   :  { %914 = vmatpush3.bf16.msra.mxu0 %v1012_v2 }
  0x63   :  { %936 = vmatpush3.bf16.msra.mxu1 %v1013_v3  ;;  %915 = vmatprep.subr.bf16.mxu0 %v1014_v4 }
  0x64   :  { %937 = vmatprep.subr.bf16.mxu1 %v1015_v5 }
  0x66   :  { %916 = vmatpush3.bf16.msra.mxu0 %v1016_v6 }
  0x67   :  { %938 = vmatpush3.bf16.msra.mxu1 %v1017_v7 }
  0x69   :  { %716 = vmatmul.mubr.bf16.vlgmr.msra.gmra.mrb[4].mxu0 %v789_v10 }
  0x6a   :  { %757 = vmatmul.mubr.bf16.vlgmr.msra.gmra.mrb[4].mxu1 %v791_v14 }
 0x11c   :  { %v873_v16 = vpop.f32.mrb[0].mxu0 }
 0x11d   :  { %v895_v17 = vpop.f32.mrb[0].mxu1  ;;  %v874_v18 = vpop.f32.mrb[1].mxu0 }
 0x11e   :  { %v875_v19 = vadd.f32 %v874_v18, %v873_v16  ;;  %v896_v20 = vpop.f32.mrb[1].mxu1  ;;  %v876_v21 = vpop.f32.mrb[2].mxu0 }
 0x11f   :  { %v897_v22 = vadd.f32 %v896_v20, %v895_v17  ;;  %v898_v23 = vpop.f32.mrb[2].mxu1  ;;  %v877_v24 = vpop.f32.mrb[3].mxu0 }
 0x120   :  { %v878_v25 = vadd.f32 %v877_v24, %v876_v21  ;;  %v899_v26 = vpop.f32.mrb[3].mxu1 }
 0x121   :  { %v677_v27 = vadd.f32 %v897_v22, %v875_v19  ;;  %v900_v28 = vadd.f32 %v899_v26, %v898_v23 }
 0x123   :  { %v680_v29 = vadd.f32 %v900_v28, %v878_v25 }
 0x13c   :  { %v917_v30 = vpop.f32.mrb[4].mxu0 }
 0x13d   :  { %v939_v31 = vpop.f32.mrb[4].mxu1  ;;  %v918_v32 = vpop.f32.mrb[5].mxu0 }
 0x13e   :  { %v919_v33 = vadd.f32 %v918_v32, %v917_v30  ;;  %v940_v34 = vpop.f32.mrb[5].mxu1  ;;  %v920_v35 = vpop.f32.mrb[6].mxu0 }
 0x13f   :  { %v941_v36 = vadd.f32 %v940_v34, %v939_v31  ;;  %v942_v37 = vpop.f32.mrb[6].mxu1  ;;  %v921_v38 = vpop.f32.mrb[7].mxu0 }
 0x140   :  { %v718_v39 = vadd.f32 %v919_v33, %v677_v27  ;;  %v922_v40 = vadd.f32 %v921_v38, %v920_v35  ;;  %v943_v41 = vpop.f32.mrb[7].mxu1 }
 0x141   :  { %v944_v42 = vadd.f32 %v943_v41, %v942_v37 }
 0x142   :  { %v759_v43 = vadd.f32 %v941_v36, %v718_v39  ;;  %v721_v44 = vadd.f32 %v922_v40, %v680_v29 }
 0x144   :  { %765 = vst [vmem:[#allocation7] sm:$0xff] %v759_v43  ;;  %v762_v45 = vadd.f32 %v944_v42, %v721_v44 }
 0x146   :  { %766 = vst [vmem:[#allocation7 + $0x8] sm:$0xff] %v762_v45 }
 0x147   :  { %1073 = shalt.err (!%p1070_p6)
}
 0x148   :  { %s1074_s12 = scalar_lea.hbm %s1152_s2, 256 }
 0x149   :  { %p1075_p7 = scmp.ne.s32.totalorder %s1152_s2, %s1074_s12  ;;  %p1078_p8 = scmp.lt.u32.totalorder %s1074_s12, %s1152_s2 }
 0x14b   :  { %p1080_p9 = pnand %p1078_p8, %p1075_p7 }
 0x14d   :  { %1083 = shalt.err (!%p1080_p9)
}
 0x14e   :  { %s1097_s17 = smov 128   ;;  %s1098_s18 = smov 8  }
 0x14f   :  { %778 = dma.vmem_to_hbm [thread:$0]  %s773_s8, 256, %s1152_s2, [#allocation4], %s1097_s17, %s1097_s17, %s1098_s18  }
 0x150   :  { %1088 = dma.done.wait [#allocation4], 256  }
 0x151   :  { %1089 = vsyncadd [#allocation4], 4294967040 }
 0x152   :  { %782 = vsyncpa [#allocation3], 1 }
 0x153   :  { %783 = vsyncpa [#allocation6], 1 }
 0x154   :  { %784 = vsyncpa [#allocation4], 1 }

</bundles_post_ra>
